<compile_context>
chip_gen: v5e
topology: v5e:2x2
jax: 0.10.0
libtpu: 0.0.40
codegen_flags: <defaults>
</compile_context>

<pallas_src>
import functools
import math

import jax
import jax.numpy as jnp
from jax import lax
from jax.experimental import pallas as pl
from jax.experimental.pallas import tpu as pltpu


def _lora_kernel(*refs, use_lora, has_bias):
    """refs = (x, w, [xa, lora_B], [bias], out, acc)."""
    it = iter(refs)
    x_ref = next(it)
    w_ref = next(it)
    xa_ref = next(it) if use_lora else None
    b_ref = next(it) if use_lora else None
    bias_ref = next(it) if has_bias else None
    o_ref = next(it)
    acc_ref = next(it)

    k = pl.program_id(2)
    n_k = pl.num_programs(2)

    @pl.when(k == 0)
    def _init():
        acc_ref[...] = jnp.zeros_like(acc_ref)

    # Base frozen linear: x (tm, tk) . W (tn, tk)^T -> (tm, tn), f32 accumulate.
    acc_ref[...] += lax.dot_general(
        x_ref[...], w_ref[...],
        dimension_numbers=(((1,), (1,)), ((), ())),
        preferred_element_type=jnp.float32)

    @pl.when(k == n_k - 1)
    def _finalize():
        out = acc_ref[...]
        if use_lora:
            # xa is already scaled in the wrapper: (tm, r) . (tn, r)^T -> (tm, tn)
            out = out + lax.dot_general(
                xa_ref[...], b_ref[...],
                dimension_numbers=(((1,), (1,)), ((), ())),
                preferred_element_type=jnp.float32)
        if has_bias:
            out = out + bias_ref[...].astype(jnp.float32)
        o_ref[...] = out.astype(o_ref.dtype)


def _pick_tile(dim, preferred, align):
    """Largest legal block size <= preferred.

    Block dims must be multiples of the vreg tile (8 sublane / 128 lane) or
    equal the full array dimension.
    """
    if dim <= preferred:
        return dim                              # full-dim block: always legal
    t = (preferred // align) * align
    while t >= align:
        if dim % t == 0:
            return t
        t -= align
    # Ragged dim with no aligned divisor <= preferred.
    # TODO(synk): masked edge tiles (pl.cdiv grid) instead of full-dim fallback,
    # which can blow VMEM for very large ragged dims.
    return dim


def _vmem_estimate(tm, tn, tk, r, use_lora, has_bias, in_item, out_item, w_bufs):
    x_b = 2 * tm * tk * in_item                 # double-buffered x
    w_b = w_bufs * tn * tk * in_item            # weight (possibly Buffered(3))
    o_b = 2 * tm * tn * out_item                # double-buffered output
    acc = tm * tn * 4                           # f32 accumulator
    extra = 0
    if use_lora:
        extra += 2 * (tm * r + tn * r) * in_item
    if has_bias:
        extra += 2 * tn * 4
    return x_b + w_b + o_b + acc + extra


def lora_linear(x, weight, lora_A=None, lora_B=None, *, lora_alpha=32, r=8,
                use_lora=True, bias=None, tm=512, tn=512, tk=1024,
                compute_dtype=None):
    """Pallas TPU implementation of LoRALinear.forward.

    x:       (..., in_features)
    weight:  (out_features, in_features)  -- PyTorch nn.Linear layout
    lora_A:  (r, in_features)
    lora_B:  (out_features, r)
    bias:    optional (out_features,)
    compute_dtype: optional dtype for MXU operands (e.g. jnp.bfloat16);
                   accumulation is always f32, output keeps x.dtype.
    """
    orig_shape = x.shape
    in_f = orig_shape[-1]
    out_f = weight.shape[0]
    x2 = x.reshape(-1, in_f)
    M = x2.shape[0]

    use_lora = bool(use_lora) and r > 0 and lora_A is not None and lora_B is not None
    has_bias = bias is not None
    out_dtype = x.dtype
    cdt = jnp.dtype(compute_dtype) if compute_dtype is not None else jnp.dtype(x.dtype)

    # --- hoisted, pre-scaled LoRA A-projection (tiny (M, r) XLA matmul) ------
    xa = None
    lora_B_c = None
    if use_lora:
        scaling = float(lora_alpha) / float(r)
        xa = (x2.astype(jnp.float32) @ lora_A.astype(jnp.float32).T) * scaling
        xa = xa.astype(cdt)
        lora_B_c = lora_B.astype(cdt)

    x2c = x2.astype(cdt)
    w_c = weight.astype(cdt)

    # --- tiling ---------------------------------------------------------------
    tm = _pick_tile(M, tm, 8)
    tn = _pick_tile(out_f, tn, 128)
    tk = _pick_tile(in_f, tk, 128)
    # v7x has 2 TensorCores: make sure at least one "parallel" axis has >= 2
    # blocks when the shapes allow it (free on v5e/v6e).
    if M // tm == 1 and out_f // tn == 1:
        half = tn // 2
        if half >= 128 and half % 128 == 0 and out_f % half == 0:
            tn = half
    grid = (M // tm, out_f // tn, in_f // tk)
    total_steps = grid[0] * grid[1] * grid[2]

    # --- specs ------------------------------------------------------------------
    in_specs = [pl.BlockSpec((tm, tk), lambda i, j, k: (i, k))]        # x
    w_bufs = 3 if total_steps >= 3 else 2
    if w_bufs == 3:
        # Weight streaming dominates HBM traffic; deeper buffering hides DMA
        # ramp bubbles at grid-step boundaries.
        in_specs.append(pl.BlockSpec((tn, tk), lambda i, j, k: (j, k),
                                     pipeline_mode=pl.Buffered(3)))
    else:
        in_specs.append(pl.BlockSpec((tn, tk), lambda i, j, k: (j, k)))
    args = [x2c, w_c]
    if use_lora:
        in_specs += [
            pl.BlockSpec((tm, r), lambda i, j, k: (i, 0)),             # xa (pre-scaled)
            pl.BlockSpec((tn, r), lambda i, j, k: (j, 0)),             # lora_B (out, r)
        ]
        args += [xa, lora_B_c]
    if has_bias:
        in_specs.append(pl.BlockSpec((1, tn), lambda i, j, k: (0, j)))
        args.append(bias.reshape(1, out_f))

    scratch_shapes = [pltpu.VMEM((tm, tn), jnp.float32)]               # f32 accumulator

    # --- VMEM budget (budget for v7x's 64 MiB; plenty of headroom elsewhere) ----
    est = _vmem_estimate(tm, tn, tk, r, use_lora, has_bias,
                         cdt.itemsize, jnp.dtype(out_dtype).itemsize, w_bufs)
    vmem_limit = int(min(max(int(est * 1.5) + (4 << 20), 32 << 20), 64 << 20))

    # --- cost estimate for XLA scheduling ---------------------------------------
    flops = 2 * M * out_f * in_f + (2 * M * out_f * r if use_lora else 0)
    bytes_accessed = (x2c.size * cdt.itemsize + w_c.size * cdt.itemsize
                      + M * out_f * jnp.dtype(out_dtype).itemsize)
    if use_lora:
        bytes_accessed += (xa.size + lora_B_c.size) * cdt.itemsize
    if has_bias:
        bytes_accessed += out_f * jnp.dtype(bias.dtype).itemsize
    cost = pl.CostEstimate(flops=int(flops), transcendentals=0,
                           bytes_accessed=int(bytes_accessed))

    kernel = functools.partial(_lora_kernel, use_lora=use_lora, has_bias=has_bias)

    out = pl.pallas_call(
        kernel,
        out_shape=jax.ShapeDtypeStruct((M, out_f), out_dtype),
        grid_spec=pltpu.PrefetchScalarGridSpec(
            num_scalar_prefetch=0,
            grid=grid,
            in_specs=in_specs,
            out_specs=pl.BlockSpec((tm, tn), lambda i, j, k: (i, j)),
            scratch_shapes=scratch_shapes),
        compiler_params=pltpu.CompilerParams(
            dimension_semantics=("parallel", "parallel", "arbitrary"),
            vmem_limit_bytes=vmem_limit),
        cost_estimate=cost,
    )(*args)

    return out.reshape(orig_shape[:-1] + (out_f,))


def _reference(x, w, a, b, bias_vec, scale, use_lora):
    y = x @ w.T
    if bias_vec is not None:
        y = y + bias_vec[None, :]
    if use_lora:
        y = y + (x @ a.T) @ b.T * scale
    return y


if __name__ == "__main__":
    # Small shapes consistent with the module: batch=16, in=32, out=64, r=8.
    M, in_features, out_features, r, lora_alpha = 16, 32, 64, 8, 32

    key = jax.random.PRNGKey(0)
    kx, kw, ka, kb, kbias = jax.random.split(key, 5)

    x = jax.random.normal(kx, (M, in_features), dtype=jnp.float32)

    # Deterministic parameter init (shapes from the module's __init__).
    bound = 1.0 / math.sqrt(in_features)
    weight = jax.random.uniform(kw, (out_features, in_features),
                                minval=-bound, maxval=bound, dtype=jnp.float32)
    lora_A = jax.random.uniform(ka, (r, in_features),
                                minval=-bound, maxval=bound, dtype=jnp.float32)
    # Module inits lora_B to zeros; use small nonzero values here so the LoRA
    # path is actually exercised numerically.
    lora_B = 0.01 * jax.random.normal(kb, (out_features, r), dtype=jnp.float32)
    bias = jax.random.normal(kbias, (out_features,), dtype=jnp.float32)

    scaling = lora_alpha / r

    # 1) LoRA path, no bias (module default), f32 compute.
    out = lora_linear(x, weight, lora_A, lora_B,
                      lora_alpha=lora_alpha, r=r, use_lora=True)
    out = jax.block_until_ready(out)
    ref = _reference(x, weight, lora_A, lora_B, None, scaling, True)
    assert out.shape == (M, out_features)
    assert jnp.allclose(out, ref, atol=1e-4, rtol=1e-4), "LoRA path mismatch"

    # 2) LoRA path with fused bias epilogue.
    out_b = lora_linear(x, weight, lora_A, lora_B,
                        lora_alpha=lora_alpha, r=r, use_lora=True, bias=bias)
    out_b = jax.block_until_ready(out_b)
    ref_b = _reference(x, weight, lora_A, lora_B, bias, scaling, True)
    assert jnp.allclose(out_b, ref_b, atol=1e-4, rtol=1e-4), "bias path mismatch"

    # 3) use_lora=False -> plain tiled matmul kernel (no dead adapter work).
    out_p = lora_linear(x, weight, use_lora=False)
    out_p = jax.block_until_ready(out_p)
    ref_p = _reference(x, weight, None, None, None, 0.0, False)
    assert jnp.allclose(out_p, ref_p, atol=1e-4, rtol=1e-4), "no-LoRA path mismatch"

    # 4) bf16 MXU fast path (f32 accumulation), looser tolerance.
    out_h = lora_linear(x, weight, lora_A, lora_B,
                        lora_alpha=lora_alpha, r=r, use_lora=True, bias=bias,
                        compute_dtype=jnp.bfloat16)
    out_h = jax.block_until_ready(out_h)
    assert jnp.allclose(out_h, ref_b, atol=5e-2, rtol=5e-2), "bf16 path mismatch"

    print("KERNEL_OK")
</pallas_src>

<mosaic_0001>
module attributes {stable_mosaic.version = 11 : i64} {
  func.func @_lora_kernel(%arg0: i32, %arg1: i32, %arg2: i32, %arg3: memref<16x32xf32, #tpu.memory_space<vmem>>, %arg4: memref<64x32xf32, #tpu.memory_space<vmem>>, %arg5: memref<16x8xf32, #tpu.memory_space<vmem>>, %arg6: memref<64x8xf32, #tpu.memory_space<vmem>>, %arg7: memref<16x64xf32, #tpu.memory_space<vmem>>, %arg8: memref<16x64xf32, #tpu.memory_space<vmem>>) attributes {dimension_semantics = [#tpu.dimension_semantics<parallel>, #tpu.dimension_semantics<parallel>, #tpu.dimension_semantics<arbitrary>], iteration_bounds = array<i64: 1, 1, 1>, scalar_prefetch = 0 : i64, scratch_operands = 1 : i64, tpu.core_type = #tpu.core_type<tc>, window_params = [{transform_indices = @transform_0, window_bounds = array<i64: 16, 32>}, {transform_indices = @transform_1, window_bounds = array<i64: 64, 32>}, {transform_indices = @transform_2, window_bounds = array<i64: 16, 8>}, {transform_indices = @transform_3, window_bounds = array<i64: 64, 8>}, {transform_indices = @transform_4, window_bounds = array<i64: 16, 64>}]} {
    %c0_i32 = arith.constant 0 : i32
    %0 = arith.cmpi eq, %arg2, %c0_i32 : i32
    %1 = arith.extui %0 : i1 to i32
    %c0_i32_0 = arith.constant 0 : i32
    %2 = arith.cmpi ne, %1, %c0_i32_0 : i32
    scf.if %2 {
      %cst_10 = arith.constant 0.000000e+00 : f32
      %12 = vector.broadcast %cst_10 : f32 to vector<16x64xf32>
      %c0_11 = arith.constant 0 : index
      %c0_12 = arith.constant 0 : index
      %13 = vector.load %arg8[%c0_11, %c0_12] : memref<16x64xf32, #tpu.memory_space<vmem>>, vector<16x64xf32>
      tpu.vector_store %arg8[%c0_11, %c0_12], %12 {strides = array<i32>} : memref<16x64xf32, #tpu.memory_space<vmem>>, vector<16x64xf32>,
    } else {
    }
    %c0 = arith.constant 0 : index
    %c0_1 = arith.constant 0 : index
    %3 = vector.load %arg8[%c0, %c0_1] : memref<16x64xf32, #tpu.memory_space<vmem>>, vector<16x64xf32>
    %c0_2 = arith.constant 0 : index
    %c0_3 = arith.constant 0 : index
    %4 = vector.load %arg3[%c0_2, %c0_3] : memref<16x32xf32, #tpu.memory_space<vmem>>, vector<16x32xf32>
    %c0_4 = arith.constant 0 : index
    %c0_5 = arith.constant 0 : index
    %5 = vector.load %arg4[%c0_4, %c0_5] : memref<64x32xf32, #tpu.memory_space<vmem>>, vector<64x32xf32>
    %cst = arith.constant dense<0.000000e+00> : vector<16x64xf32>
    %6 = tpu.matmul %4, %5, %cst {dimension_numbers = #tpu.dot_dimension_numbers<[1], [1], [0], [0], [0, 0, 1, 0], [], []>} : vector<16x32xf32>, vector<64x32xf32>, vector<16x64xf32> -> vector<16x64xf32>
    %7 = arith.addf %3, %6 : vector<16x64xf32>
    %c0_6 = arith.constant 0 : index
    %c0_7 = arith.constant 0 : index
    %8 = vector.load %arg8[%c0_6, %c0_7] : memref<16x64xf32, #tpu.memory_space<vmem>>, vector<16x64xf32>
    tpu.vector_store %arg8[%c0_6, %c0_7], %7 {strides = array<i32>} : memref<16x64xf32, #tpu.memory_space<vmem>>, vector<16x64xf32>,
    %c0_i32_8 = arith.constant 0 : i32
    %9 = arith.cmpi eq, %arg2, %c0_i32_8 : i32
    %10 = arith.extui %9 : i1 to i32
    %c0_i32_9 = arith.constant 0 : i32
    %11 = arith.cmpi ne, %10, %c0_i32_9 : i32
    scf.if %11 {
      %c0_10 = arith.constant 0 : index
      %c0_11 = arith.constant 0 : index
      %12 = vector.load %arg8[%c0_10, %c0_11] : memref<16x64xf32, #tpu.memory_space<vmem>>, vector<16x64xf32>
      %c0_12 = arith.constant 0 : index
      %c0_13 = arith.constant 0 : index
      %13 = vector.load %arg5[%c0_12, %c0_13] : memref<16x8xf32, #tpu.memory_space<vmem>>, vector<16x8xf32>
      %c0_14 = arith.constant 0 : index
      %c0_15 = arith.constant 0 : index
      %14 = vector.load %arg6[%c0_14, %c0_15] : memref<64x8xf32, #tpu.memory_space<vmem>>, vector<64x8xf32>
      %cst_16 = arith.constant dense<0.000000e+00> : vector<16x64xf32>
      %15 = tpu.matmul %13, %14, %cst_16 {dimension_numbers = #tpu.dot_dimension_numbers<[1], [1], [0], [0], [0, 0, 1, 0], [], []>} : vector<16x8xf32>, vector<64x8xf32>, vector<16x64xf32> -> vector<16x64xf32>
      %16 = arith.addf %12, %15 : vector<16x64xf32>
      %c0_17 = arith.constant 0 : index
      %c0_18 = arith.constant 0 : index
      %17 = vector.load %arg7[%c0_17, %c0_18] : memref<16x64xf32, #tpu.memory_space<vmem>>, vector<16x64xf32>
      tpu.vector_store %arg7[%c0_17, %c0_18], %16 {strides = array<i32>} : memref<16x64xf32, #tpu.memory_space<vmem>>, vector<16x64xf32>,
    } else {
    }
    return
  }
  func.func @transform_0(%arg0: i32, %arg1: i32, %arg2: i32) -> (i32, i32) {
    %c0_i32 = arith.constant 0 : i32
    return %arg0, %arg2 : i32, i32
  }
  func.func @transform_1(%arg0: i32, %arg1: i32, %arg2: i32) -> (i32, i32) {
    %c0_i32 = arith.constant 0 : i32
    return %arg1, %arg2 : i32, i32
  }
  func.func @transform_2(%arg0: i32, %arg1: i32, %arg2: i32) -> (i32, i32) {
    %c0_i32 = arith.constant 0 : i32
    %c0_i32_0 = arith.constant 0 : i32
    return %arg0, %c0_i32 : i32, i32
  }
  func.func @transform_3(%arg0: i32, %arg1: i32, %arg2: i32) -> (i32, i32) {
    %c0_i32 = arith.constant 0 : i32
    %c0_i32_0 = arith.constant 0 : i32
    return %arg1, %c0_i32 : i32, i32
  }
  func.func @transform_4(%arg0: i32, %arg1: i32, %arg2: i32) -> (i32, i32) {
    %c0_i32 = arith.constant 0 : i32
    return %arg0, %arg1 : i32, i32
  }
}

</mosaic_0001>

<bundles_post_ra>
// kernel: tpu_custom_call.1
= control target key start
LH: loop header
LB: loop body
LE: loop exit
PB: predicated region body
PF: predicated region fallthrough
CT: control target
= control target key end

     0   :  { %vm37_vm0 = vcmask 261120   ;;  %vm111_vm1 = vcmask 64512   ;;  %vm22_vm2 = vcmask 523264   ;;  %v253_v3 = vmov 0.0   ;;  %s387_s0 = inlined_call_operand.vmem [shape: f32[16,32], index: 0, kind: input, shape index: {}]   ;;  %s388_s1 = inlined_call_operand.vmem [shape: f32[64,32], index: 1, kind: input, shape index: {}]   ;;  %s389_s2 = inlined_call_operand.vmem [shape: f32[16,8], index: 2, kind: input, shape index: {}]   ;;  %s390_s3 = inlined_call_operand.vmem [shape: f32[64,8], index: 3, kind: input, shape index: {}]   ;;  %s391_s4 = inlined_call_operand.hbm [shape: f32[16,64], index: 4, kind: output, shape index: {}]  }
   0x1   :  { %v36_v0 = vld [vmem:[%s388_s1 + $0x38] sm:$0xff]  ;;  %v35_v2 = vld [vmem:[%s388_s1 + $0x30] sm:$0xff]  ;;  %23 = vst.msk [vmem:[#allocation2] sm:$0xff] %vm22_vm2, %v253_v3  ;;  %v34_v5 = vld [vmem:[%s388_s1 + $0x28] sm:$0xff] }
   0x2   :  { %207 = vmatpush.xpose.msk.msra.mxu2 %vm37_vm0, %v36_v0  ;;  %187 = vmatpush.xpose.msk.msra.mxu0 %vm37_vm0, %v36_v0  ;;  %v110_v1 = vld [vmem:[%s390_s3 + $0x38] sm:$0xff]  ;;  %v109_v4 = vld [vmem:[%s390_s3 + $0x30] sm:$0xff]  ;;  %24 = vst.msk [vmem:[#allocation2 + $0x8] sm:$0xff] %vm22_vm2, %v253_v3 }
   0x3   :  { %215 = vmatpush.xpose.msk.msra.mxu3 %vm111_vm1, %v110_v1  ;;  %197 = vmatpush.xpose.msk.msra.mxu1 %vm111_vm1, %v110_v1 }
   0x6   :  { %208 = vmatpush.xpose.msk.msra.mxu2 %vm37_vm0, %v35_v2  ;;  %188 = vmatpush.xpose.msk.msra.mxu0 %vm37_vm0, %v35_v2 }
   0x7   :  { %216 = vmatpush.xpose.msk.msra.mxu3 %vm111_vm1, %v109_v4  ;;  %198 = vmatpush.xpose.msk.msra.mxu1 %vm111_vm1, %v109_v4 }
   0x8   :  { %9 = vsyncpa [#allocation4], 0  ;;  %v108_v6 = vld [vmem:[%s390_s3 + $0x28] sm:$0xff]  ;;  %v33_v7 = vld [vmem:[%s388_s1 + $0x20] sm:$0xff]  ;;  %s175_s29 = sshll.u32 %s391_s4, 4  ;;  %s255_s30 = smov 128   ;;  %s176_s29 = int_to_ptr.hbm [resolvable:$true] %s175_s29 }
   0x9   :  { %v107_v8 = vld [vmem:[%s390_s3 + $0x20] sm:$0xff]  ;;  %v32_v9 = vld [vmem:[%s388_s1 + $0x18] sm:$0xff]  ;;  %v31_v11 = vld [vmem:[%s388_s1 + $0x10] sm:$0xff]  ;;  %s256_s5 = smov 8  }
   0xa   :  { %209 = vmatpush.xpose.msk.msra.mxu2 %vm37_vm0, %v34_v5  ;;  %189 = vmatpush.xpose.msk.msra.mxu0 %vm37_vm0, %v34_v5  ;;  %v106_v10 = vld [vmem:[%s390_s3 + $0x18] sm:$0xff]  ;;  %v105_v12 = vld [vmem:[%s390_s3 + $0x10] sm:$0xff]  ;;  %v30_v13 = vld [vmem:[%s388_s1 + $0x8] sm:$0xff] }
   0xb   :  { %217 = vmatpush.xpose.msk.msra.mxu3 %vm111_vm1, %v108_v6  ;;  %199 = vmatpush.xpose.msk.msra.mxu1 %vm111_vm1, %v108_v6  ;;  %v104_v14 = vld [vmem:[%s390_s3 + $0x8] sm:$0xff]  ;;  %v29_v15 = vld [vmem:[%s388_s1] sm:$0xff] }
   0xc   :  { %v103_v16 = vld [vmem:[%s390_s3] sm:$0xff]  ;;  %v28_v17 = vld [vmem:[%s387_s0 + $0x8] sm:$0xff] }
   0xd   :  { %v27_v18 = vld [vmem:[%s387_s0] sm:$0xff]  ;;  %v102_v19 = vld [vmem:[%s389_s2 + $0x8] sm:$0xff]  ;;  %s254_s0 = smov [#allocation3]  }
   0xe   :  { %210 = vmatpush.xpose.msk.msra.mxu2 %vm37_vm0, %v33_v7  ;;  %190 = vmatpush.xpose.msk.msra.mxu0 %vm37_vm0, %v33_v7  ;;  %v101_v20 = vld [vmem:[%s389_s2] sm:$0xff]  ;;  %v26_v24 = vld [vmem:[#allocation2 + $0x8] sm:$0xff]  ;;  %s173_s2 = sshll.u32 %s254_s0, 4  ;;  %s174_s2 = int_to_ptr.vmem [resolvable:$true] %s173_s2 }
   0xf   :  { %218 = vmatpush.xpose.msk.msra.mxu3 %vm111_vm1, %v107_v8  ;;  %200 = vmatpush.xpose.msk.msra.mxu1 %vm111_vm1, %v107_v8  ;;  %v25_v21 = vld [vmem:[#allocation2] sm:$0xff] }
  0x12   :  { %211 = vmatpush.xpose.msk.msra.mxu2 %vm37_vm0, %v32_v9  ;;  %191 = vmatpush.xpose.msk.msra.mxu0 %vm37_vm0, %v32_v9 }
  0x13   :  { %219 = vmatpush.xpose.msk.msra.mxu3 %vm111_vm1, %v106_v10  ;;  %201 = vmatpush.xpose.msk.msra.mxu1 %vm111_vm1, %v106_v10 }
  0x16   :  { %212 = vmatpush.xpose.msk.msra.mxu2 %vm37_vm0, %v31_v11  ;;  %192 = vmatpush.xpose.msk.msra.mxu0 %vm37_vm0, %v31_v11 }
  0x17   :  { %220 = vmatpush.xpose.msk.msra.mxu3 %vm111_vm1, %v105_v12  ;;  %202 = vmatpush.xpose.msk.msra.mxu1 %vm111_vm1, %v105_v12 }
  0x1a   :  { %213 = vmatpush.xpose.msk.msra.mxu2 %vm37_vm0, %v30_v13  ;;  %193 = vmatpush.xpose.msk.msra.mxu0 %vm37_vm0, %v30_v13 }
  0x1b   :  { %221 = vmatpush.xpose.msk.msra.mxu3 %vm111_vm1, %v104_v14  ;;  %203 = vmatpush.xpose.msk.msra.mxu1 %vm111_vm1, %v104_v14 }
  0x1e   :  { %214 = vmatpush.xpose.msk.msra.mxu2 %vm37_vm0, %v29_v15  ;;  %194 = vmatpush.xpose.msk.msra.mxu0 %vm37_vm0, %v29_v15 }
  0x1f   :  { %222 = vmatpush.xpose.msk.msra.mxu3 %vm111_vm1, %v103_v16  ;;  %204 = vmatpush.xpose.msk.msra.mxu1 %vm111_vm1, %v103_v16 }
  0x21   :  { %196 = vmatmul.msk.f32.vlgmr.msra.gmra.mxu2 %vm37_vm0, %v28_v17  ;;  %195 = vmatmul.msk.f32.vlgmr.msra.gmra.mxu0 %vm37_vm0, %v27_v18 }
  0x22   :  { %206 = vmatmul.msk.f32.vlgmr.msra.gmra.mxu3 %vm111_vm1, %v102_v19  ;;  %205 = vmatmul.msk.f32.vlgmr.msra.gmra.mxu1 %vm111_vm1, %v101_v20 }
  0x9e   :  { %v85_v22 = vpop.f32.mrf.mxu0 }
  0x9f   :  { %v91_v23 = vadd.f32 %v85_v22, %v25_v21  ;;  %v159_v27 = vpop.f32.mrf.mxu1 }
  0xa1   :  { %94 = vst.msk [vmem:[#allocation2] sm:$0xff] %vm22_vm2, %v91_v23 }
  0xa4   :  { %v88_v25 = vpop.f32.mrf.mxu2 }
  0xa5   :  { %v92_v26 = vadd.f32 %v88_v25, %v26_v24  ;;  %v162_v30 = vpop.f32.mrf.mxu3 }
  0xa7   :  { %95 = vst.msk [vmem:[#allocation2 + $0x8] sm:$0xff] %vm22_vm2, %v92_v26 }
  0xa8   :  { %v99_v28 = vld [vmem:[#allocation2] sm:$0xff] }
  0xa9   :  { %v165_v29 = vadd.f32 %v159_v27, %v99_v28 }
  0xab   :  { %167 = vst.msk [vmem:[#allocation3] sm:$0xff] %vm22_vm2, %v165_v29 }
  0xae   :  { %v100_v31 = vld [vmem:[#allocation2 + $0x8] sm:$0xff] }
  0xaf   :  { %v166_v32 = vadd.f32 %v162_v30, %v100_v31 }
  0xb1   :  { %168 = vst.msk [vmem:[#allocation3 + $0x8] sm:$0xff] %vm22_vm2, %v166_v32 }
  0xb2   :  { %181 = dma.vmem_to_hbm [thread:$0]  %s174_s2, 256, %s176_s29, [#allocation4], %s255_s30, %s255_s30, %s256_s5  }
  0xb3   :  { %251 = dma.done.wait [#allocation4], 256  }
  0xb4   :  { %252 = vsyncadd [#allocation4], 4294967040 }
  0xb5   :  { %186 = vsyncpa [#allocation4], 1 }

</bundles_post_ra>
